<compile_context>
chip_gen: v5e
topology: v5e:2x2
jax: 0.10.0
libtpu: 0.0.40
codegen_flags: <defaults>
</compile_context>

<pallas_src>
import functools
import math

import jax
import jax.numpy as jnp
from jax.experimental import pallas as pl
from jax.experimental.pallas import tpu as pltpu


# ----------------------------------------------------------------------------
# Generation-aware VMEM budgets
# ----------------------------------------------------------------------------
def _round_up(x, m):
    return ((x + m - 1) // m) * m


def _vmem_limit_bytes():
    """Scoped-VMEM limit derived from the chip's physical VMEM capacity."""
    cap = 64 * 1024 * 1024  # conservative fallback (v7x per-core VMEM)
    try:
        info = pltpu.get_tpu_info()
        cap = int(getattr(info, "vmem_capacity_bytes", cap) or cap)
    except Exception:
        pass
    limit = min(int(cap * 0.70), cap - (16 << 20))   # keep >=16 MiB headroom
    return int(max(32 << 20, min(limit, cap)))


_VMEM_LIMIT = _vmem_limit_bytes()
# Leave ~20% of the scoped limit for Mosaic-internal scratch / spills.
_BLOCK_BUDGET = int(_VMEM_LIMIT * 0.8)


# ----------------------------------------------------------------------------
# Kernel 1: head-grouped, q-tiled attention read/written in (B, N, C) layout
# ----------------------------------------------------------------------------
def _attn_kernel(q_ref, k_ref, v_ref, o_ref, *attn_refs,
                 scale, heads, head_dim, return_attn):
    """q_ref: (tq, Hb*D); k_ref/v_ref: (Nk, Hb*D); o_ref: (tq, Hb*D);
    attn_refs[0] (optional): (Hb, tq, Nk)."""
    D = head_dim
    attn_ref = attn_refs[0] if return_attn else None

    # One load per operand; fold 1/sqrt(D) into q once (tq*Hb*D multiplies).
    q_all = q_ref[...] * scale
    k_all = k_ref[...]
    v_all = v_ref[...]

    outs = []
    for hh in range(heads):                      # static, unrolled
        sl = slice(hh * D, (hh + 1) * D)
        q_h = q_all[:, sl]                       # (tq, D)
        k_h = k_all[:, sl]                       # (Nk, D)
        v_h = v_all[:, sl]                       # (Nk, D)

        # Scores on the MXU (contract over D, no materialized k transpose),
        # f32 accumulation regardless of input dtype.
        s = jax.lax.dot_general(
            q_h, k_h, (((1,), (1,)), ((), ())),
            preferred_element_type=jnp.float32)  # (tq, Nk)

        m = jnp.max(s, axis=-1, keepdims=True)
        e = jnp.exp(s - m)
        denom = jnp.sum(e, axis=-1, keepdims=True)
        # Exact normalization (cheap: (tq,1) divide) -> rows sum to 1, matching
        # torch softmax for downstream consumers of the attention weights.
        p = e * (1.0 / denom)

        if return_attn:
            attn_ref[hh] = p.astype(attn_ref.dtype)

        # PV matmul: probs in the value dtype (bf16 MXU rate for bf16 inputs).
        o_h = jax.lax.dot_general(
            p.astype(v_h.dtype), v_h, (((1,), (0,)), ((), ())),
            preferred_element_type=jnp.float32)  # (tq, D)
        outs.append(o_h.astype(o_ref.dtype))

    # Single lane-dense store of the whole (tq, Hb*D) block: the output is
    # produced directly in (B, Nq, C) layout -> no post-attention transpose.
    o_ref[...] = outs[0] if len(outs) == 1 else jnp.concatenate(outs, axis=-1)


def _attn_tiles(H, Nq, Nk, D, in_isz, attn_isz, return_attn, budget):
    """Pick (head-group Hb, q-tile tq) under the per-block-set VMEM budget."""
    # Head-group candidates whose lane width Hb*D is 128-aligned (lane-dense
    # output block); Hb == H (full C) is always a legal block shape.
    cands = [h for h in range(1, H + 1) if H % h == 0 and (h * D) % 128 == 0]
    if H not in cands:
        cands.append(H)
    cands = sorted(set(cands), reverse=True)

    # q-tile candidates: big, 128-aligned tiles first; small Nq -> one full
    # 8-aligned tile (Nq gets padded up to the chosen tile in the wrapper).
    tq_opts = sorted({t for t in (512, 256, 128) if t <= Nq}
                     | {min(_round_up(Nq, 8), 512)}, reverse=True)

    def blk_bytes(hb, tq):
        hd = hb * D
        q_o = 2 * tq * hd * in_isz                     # q block + out block
        k_v = 2 * Nk * hd * in_isz                     # k block + v block
        att = hb * tq * Nk * attn_isz if return_attn else 0
        score = 2 * tq * Nk * 4                        # live f32 scores (1 head)
        return 2 * (q_o + k_v + att) + score           # x2: double buffering

    for tq in tq_opts:            # prefer large q tiles (mem-bound lever)
        for hb in cands:          # then the largest head group that fits
            if blk_bytes(hb, tq) <= budget:
                return hb, tq
    return min(cands), min(tq_opts)


def _attention(q, k, v, num_heads, head_dim, scale, return_attn=True):
    """q/k/v: (B, N, C) -> out (B, Nq, C) [+ attn (B, H, Nq, Nk)]."""
    B, Nq, C = q.shape
    _, Nk, _ = k.shape
    H, D = num_heads, head_dim
    in_isz = q.dtype.itemsize
    attn_isz = q.dtype.itemsize

    Hb, tq = _attn_tiles(H, Nq, Nk, D, in_isz, attn_isz, return_attn,
                         _BLOCK_BUDGET)
    Nq_pad = _round_up(Nq, tq)
    if Nq_pad != Nq:
        # Zero-padded q rows produce finite (uniform) rows that are sliced off.
        q = jnp.pad(q, ((0, 0), (0, Nq_pad - Nq), (0, 0)))

    hd = Hb * D
    kernel = functools.partial(_attn_kernel, scale=scale, heads=Hb,
                               head_dim=D, return_attn=return_attn)

    if return_attn:
        out_shape = (jax.ShapeDtypeStruct((B, Nq_pad, C), q.dtype),
                     jax.ShapeDtypeStruct((B, H, Nq_pad, Nk), q.dtype))
        out_specs = [
            pl.BlockSpec((None, tq, hd), lambda b, h, i: (b, i, h)),
            pl.BlockSpec((None, Hb, tq, Nk), lambda b, h, i: (b, h, i, 0)),
        ]
    else:
        out_shape = jax.ShapeDtypeStruct((B, Nq_pad, C), q.dtype)
        out_specs = pl.BlockSpec((None, tq, hd), lambda b, h, i: (b, i, h))

    cost = pl.CostEstimate(
        flops=4 * B * H * Nq_pad * Nk * D,
        transcendentals=B * H * Nq_pad * Nk,
        bytes_accessed=in_isz * B * (2 * Nq_pad * C + 2 * Nk * C)
        + (attn_isz * B * H * Nq_pad * Nk if return_attn else 0),
    )

    results = pl.pallas_call(
        kernel,
        out_shape=out_shape,
        grid_spec=pltpu.PrefetchScalarGridSpec(
            num_scalar_prefetch=0,
            grid=(B, H // Hb, Nq_pad // tq),
            in_specs=[
                pl.BlockSpec((None, tq, hd), lambda b, h, i: (b, i, h)),
                pl.BlockSpec((None, Nk, hd), lambda b, h, i: (b, 0, h)),
                pl.BlockSpec((None, Nk, hd), lambda b, h, i: (b, 0, h)),
            ],
            out_specs=out_specs,
        ),
        compiler_params=pltpu.CompilerParams(
            # q axis innermost & "arbitrary": K/V blocks stay resident across
            # q tiles and megacore sharding (v7x) goes to the B / head axes.
            dimension_semantics=("parallel", "parallel", "arbitrary"),
            vmem_limit_bytes=_VMEM_LIMIT,
        ),
        cost_estimate=cost,
    )(q, k, v)

    if return_attn:
        out_p, attn_p = results
        out = out_p if Nq_pad == Nq else out_p[:, :Nq]
        attn = attn_p if Nq_pad == Nq else attn_p[:, :, :Nq]
        return out, attn
    out_p = results
    return (out_p if Nq_pad == Nq else out_p[:, :Nq]), None


# ----------------------------------------------------------------------------
# Kernel 2: output projection  y = x @ W^T + b
# ----------------------------------------------------------------------------
def _proj_kernel_fused(x_ref, wt_ref, b_ref, o_ref):
    # Single-shot reduction over Cin: no accumulator scratch, no k-axis.
    acc = jnp.dot(x_ref[...], wt_ref[...], preferred_element_type=jnp.float32)
    o_ref[...] = (acc + b_ref[...].astype(jnp.float32)).astype(o_ref.dtype)


def _proj_kernel_acc(x_ref, wt_ref, b_ref, o_ref, acc_ref):
    @pl.when(pl.program_id(2) == 0)
    def _():
        acc_ref[...] = jnp.zeros_like(acc_ref)

    acc_ref[...] += jnp.dot(x_ref[...], wt_ref[...],
                            preferred_element_type=jnp.float32)

    @pl.when(pl.program_id(2) == pl.num_programs(2) - 1)
    def _():
        o_ref[...] = (acc_ref[...] + b_ref[...].astype(jnp.float32)
                      ).astype(o_ref.dtype)


def _pick_lane_tile(n, pref):
    """Largest 128-multiple tile <= pref dividing n, else the full dim."""
    if n <= pref or n % 128 != 0:
        return n
    t = pref
    while t >= 128:
        if n % t == 0:
            return t
        t //= 2
    return n


def _linear(x2d, weight_t, bias2d):
    """x2d: (M, Cin); weight_t: (Cin, Cout) pre-transposed; bias2d: (1, Cout)."""
    M, Cin = x2d.shape
    Cout = weight_t.shape[1]
    isz = x2d.dtype.itemsize

    tn = _pick_lane_tile(Cout, 256)
    collapse_k = Cin <= 2048            # fold the whole reduction into 1 step
    tk = Cin if collapse_k else _pick_lane_tile(Cin, 512)

    # Row tile: prefer large 128-aligned tiles that fit the budget while
    # minimizing padding waste; small M -> one full 8-aligned tile.
    if M < 128:
        tm = _round_up(M, 8)
    else:
        tm, best = 128, None
        for t in (512, 256, 128):
            blk = 2 * isz * (t * tk + tk * tn + t * tn) + 4 * t * tn
            if blk > _BLOCK_BUDGET:
                continue
            key = (_round_up(M, t), -t)
            if best is None or key < best:
                best, tm = key, t
    M_pad = _round_up(M, tm)
    if M_pad != M:
        x2d = jnp.pad(x2d, ((0, M_pad - M), (0, 0)))

    cost = pl.CostEstimate(
        flops=2 * M_pad * Cin * Cout,
        transcendentals=0,
        bytes_accessed=isz * (M_pad * Cin + Cin * Cout + Cout + M_pad * Cout),
    )
    params = pltpu.CompilerParams(
        dimension_semantics=(("parallel", "parallel") if collapse_k
                             else ("parallel", "parallel", "arbitrary")),
        vmem_limit_bytes=_VMEM_LIMIT,
    )

    if collapse_k:
        out = pl.pallas_call(
            _proj_kernel_fused,
            out_shape=jax.ShapeDtypeStruct((M_pad, Cout), x2d.dtype),
            grid_spec=pltpu.PrefetchScalarGridSpec(
                num_scalar_prefetch=0,
                grid=(M_pad // tm, Cout // tn),
                in_specs=[
                    pl.BlockSpec((tm, Cin), lambda i, j: (i, 0)),
                    pl.BlockSpec((Cin, tn), lambda i, j: (0, j)),
                    pl.BlockSpec((1, tn), lambda i, j: (0, j)),
                ],
                out_specs=pl.BlockSpec((tm, tn), lambda i, j: (i, j)),
            ),
            compiler_params=params,
            cost_estimate=cost,
        )(x2d, weight_t, bias2d)
    else:
        out = pl.pallas_call(
            _proj_kernel_acc,
            out_shape=jax.ShapeDtypeStruct((M_pad, Cout), x2d.dtype),
            grid_spec=pltpu.PrefetchScalarGridSpec(
                num_scalar_prefetch=0,
                grid=(M_pad // tm, Cout // tn, Cin // tk),
                in_specs=[
                    pl.BlockSpec((tm, tk), lambda i, j, kk: (i, kk)),
                    pl.BlockSpec((tk, tn), lambda i, j, kk: (kk, j)),
                    pl.BlockSpec((1, tn), lambda i, j, kk: (0, j)),
                ],
                out_specs=pl.BlockSpec((tm, tn), lambda i, j, kk: (i, j)),
                scratch_shapes=[pltpu.VMEM((tm, tn), jnp.float32)],
            ),
            compiler_params=params,
            cost_estimate=cost,
        )(x2d, weight_t, bias2d)

    return out if M_pad == M else out[:M]


# ----------------------------------------------------------------------------
# Module wrapper
# ----------------------------------------------------------------------------
class MultiheadAttentionPallas:
    def __init__(self, embedding_dim, num_heads=8, key=None):
        assert embedding_dim % num_heads == 0, 'dim should be divisible by num_heads'
        self.num_heads = num_heads
        self.head_dim = embedding_dim // num_heads
        self.scale = self.head_dim ** (-0.5)
        self.embedding_dim = embedding_dim

        if key is None:
            key = jax.random.PRNGKey(0)
        kw, kb = jax.random.split(key)
        # nn.Linear default init: U(-1/sqrt(fan_in), 1/sqrt(fan_in))
        bound = 1.0 / math.sqrt(embedding_dim)
        self.proj_weight = jax.random.uniform(
            kw, (embedding_dim, embedding_dim), jnp.float32, -bound, bound)
        self.proj_bias = jax.random.uniform(
            kb, (embedding_dim,), jnp.float32, -bound, bound)
        # Constant parameters: pre-transpose W once; bias as a (1, Cout) row.
        self.proj_weight_t = self.proj_weight.T
        self.proj_bias2d = self.proj_bias.reshape(1, embedding_dim)

    def __call__(self, q, k, v, return_attn=True):
        B, Nq, C = q.shape
        # Attention reads q/k/v directly in (B, N, C) layout and writes its
        # output directly in (B, Nq, C) layout -> no wrapper transposes.
        out, attn = _attention(q, k, v, self.num_heads, self.head_dim,
                               self.scale, return_attn=return_attn)
        out = _linear(out.reshape(B * Nq, C), self.proj_weight_t,
                      self.proj_bias2d)
        out = out.reshape(B, Nq, C)
        return (out, attn) if return_attn else out


# ----------------------------------------------------------------------------
# Reference (pure JAX) for correctness check
# ----------------------------------------------------------------------------
def _reference(mod, q, k, v):
    B, Nq, C = q.shape
    _, Nk, _ = k.shape
    H, D = mod.num_heads, mod.head_dim
    qh = q.reshape(B, Nq, H, D).transpose(0, 2, 1, 3)
    kh = k.reshape(B, Nk, H, D).transpose(0, 2, 1, 3)
    vh = v.reshape(B, Nk, H, D).transpose(0, 2, 1, 3)
    s = jnp.einsum("bhqd,bhkd->bhqk", qh, kh) * mod.scale
    attn = jax.nn.softmax(s, axis=-1)
    out = jnp.einsum("bhqk,bhkd->bhqd", attn, vh)
    out = out.transpose(0, 2, 1, 3).reshape(B, Nq, C)
    out = out @ mod.proj_weight.T + mod.proj_bias
    return out, attn


if __name__ == "__main__":
    key = jax.random.PRNGKey(0)
    kq, kk, kv, kp = jax.random.split(key, 4)

    B = 2
    N = 16            # sequence length (e.g. a 4x4 spatial grid flattened)
    C = 32            # embedding_dim
    H = 4             # num_heads -> head_dim = 8

    q = jax.random.normal(kq, (B, N, C), jnp.float32)
    k = jax.random.normal(kk, (B, N, C), jnp.float32)
    v = jax.random.normal(kv, (B, N, C), jnp.float32)

    mha = MultiheadAttentionPallas(embedding_dim=C, num_heads=H, key=kp)
    forward = jax.jit(mha.__call__)

    out, attn = forward(q, k, v)
    out = jax.block_until_ready(out)
    attn = jax.block_until_ready(attn)

    out_ref, attn_ref = _reference(mha, q, k, v)
    assert out.shape == (B, N, C) and attn.shape == (B, H, N, N)
    assert jnp.allclose(out, out_ref, atol=2e-3, rtol=2e-3)
    assert jnp.allclose(attn, attn_ref, atol=2e-3, rtol=2e-3)

    print("KERNEL_OK")
</pallas_src>

<mosaic_0001>
module attributes {stable_mosaic.version = 11 : i64} {
  func.func @_proj_kernel_fused(%arg0: i32, %arg1: i32, %arg2: memref<32x32xf32, #tpu.memory_space<vmem>>, %arg3: memref<32x32xf32, #tpu.memory_space<vmem>>, %arg4: memref<1x32xf32, #tpu.memory_space<vmem>>, %arg5: memref<32x32xf32, #tpu.memory_space<vmem>>) attributes {dimension_semantics = [#tpu.dimension_semantics<parallel>, #tpu.dimension_semantics<parallel>], iteration_bounds = array<i64: 1, 1>, scalar_prefetch = 0 : i64, scratch_operands = 0 : i64, tpu.core_type = #tpu.core_type<tc>, window_params = [{transform_indices = @transform_0, window_bounds = array<i64: 32, 32>}, {transform_indices = @transform_1, window_bounds = array<i64: 32, 32>}, {transform_indices = @transform_2, window_bounds = array<i64: 1, 32>}, {transform_indices = @transform_3, window_bounds = array<i64: 32, 32>}]} {
    %c0 = arith.constant 0 : index
    %c0_0 = arith.constant 0 : index
    %0 = vector.load %arg2[%c0, %c0_0] : memref<32x32xf32, #tpu.memory_space<vmem>>, vector<32x32xf32>
    %c0_1 = arith.constant 0 : index
    %c0_2 = arith.constant 0 : index
    %1 = vector.load %arg3[%c0_1, %c0_2] : memref<32x32xf32, #tpu.memory_space<vmem>>, vector<32x32xf32>
    %cst = arith.constant dense<0.000000e+00> : vector<32x32xf32>
    %2 = tpu.matmul %0, %1, %cst {dimension_numbers = #tpu.dot_dimension_numbers<[1], [0], [0], [1], [0, 0, 1, 1], [], []>} : vector<32x32xf32>, vector<32x32xf32>, vector<32x32xf32> -> vector<32x32xf32>
    %c0_3 = arith.constant 0 : index
    %c0_4 = arith.constant 0 : index
    %3 = vector.load %arg4[%c0_3, %c0_4] : memref<1x32xf32, #tpu.memory_space<vmem>>, vector<1x32xf32>
    %4 = vector.broadcast %3 : vector<1x32xf32> to vector<32x32xf32>
    %5 = arith.addf %2, %4 : vector<32x32xf32>
    %c0_5 = arith.constant 0 : index
    %c0_6 = arith.constant 0 : index
    %6 = vector.load %arg5[%c0_5, %c0_6] : memref<32x32xf32, #tpu.memory_space<vmem>>, vector<32x32xf32>
    tpu.vector_store %arg5[%c0_5, %c0_6], %5 {strides = array<i32>} : memref<32x32xf32, #tpu.memory_space<vmem>>, vector<32x32xf32>,
    return
  }
  func.func @transform_0(%arg0: i32, %arg1: i32) -> (i32, i32) {
    %c0_i32 = arith.constant 0 : i32
    %c0_i32_0 = arith.constant 0 : i32
    return %arg0, %c0_i32 : i32, i32
  }
  func.func @transform_1(%arg0: i32, %arg1: i32) -> (i32, i32) {
    %c0_i32 = arith.constant 0 : i32
    %c0_i32_0 = arith.constant 0 : i32
    return %c0_i32, %arg1 : i32, i32
  }
  func.func @transform_2(%arg0: i32, %arg1: i32) -> (i32, i32) {
    %c0_i32 = arith.constant 0 : i32
    %c0_i32_0 = arith.constant 0 : i32
    return %c0_i32, %arg1 : i32, i32
  }
  func.func @transform_3(%arg0: i32, %arg1: i32) -> (i32, i32) {
    %c0_i32 = arith.constant 0 : i32
    return %arg0, %arg1 : i32, i32
  }
}

module attributes {stable_mosaic.version = 11 : i64} {
  func.func @_attn_kernel(%arg0: i32, %arg1: i32, %arg2: i32, %arg3: memref<1x16x32xf32, #tpu.memory_space<vmem>>, %arg4: memref<1x16x32xf32, #tpu.memory_space<vmem>>, %arg5: memref<1x16x32xf32, #tpu.memory_space<vmem>>, %arg6: memref<1x16x32xf32, #tpu.memory_space<vmem>>, %arg7: memref<1x4x16x16xf32, #tpu.memory_space<vmem>>) attributes {dimension_semantics = [#tpu.dimension_semantics<parallel>, #tpu.dimension_semantics<parallel>, #tpu.dimension_semantics<arbitrary>], iteration_bounds = array<i64: 2, 1, 1>, scalar_prefetch = 0 : i64, scratch_operands = 0 : i64, tpu.core_type = #tpu.core_type<tc>, window_params = [{transform_indices = @transform_0, window_bounds = array<i64: 1, 16, 32>}, {transform_indices = @transform_1, window_bounds = array<i64: 1, 16, 32>}, {transform_indices = @transform_2, window_bounds = array<i64: 1, 16, 32>}, {transform_indices = @transform_3, window_bounds = array<i64: 1, 16, 32>}, {transform_indices = @transform_4, window_bounds = array<i64: 1, 4, 16, 16>}]} {
    %c0 = arith.constant 0 : index
    %c0_0 = arith.constant 0 : index
    %c0_1 = arith.constant 0 : index
    %0 = vector.load %arg3[%c0, %c0_0, %c0_1] : memref<1x16x32xf32, #tpu.memory_space<vmem>>, vector<1x16x32xf32>
    %1 = vector.shape_cast %0 : vector<1x16x32xf32> to vector<16x32xf32>
    %cst = arith.constant 0.353553385 : f32
    %2 = vector.broadcast %cst : f32 to vector<16x32xf32>
    %3 = arith.mulf %1, %2 : vector<16x32xf32>
    %c0_2 = arith.constant 0 : index
    %c0_3 = arith.constant 0 : index
    %c0_4 = arith.constant 0 : index
    %4 = vector.load %arg4[%c0_2, %c0_3, %c0_4] : memref<1x16x32xf32, #tpu.memory_space<vmem>>, vector<1x16x32xf32>
    %5 = vector.shape_cast %4 : vector<1x16x32xf32> to vector<16x32xf32>
    %c0_5 = arith.constant 0 : index
    %c0_6 = arith.constant 0 : index
    %c0_7 = arith.constant 0 : index
    %6 = vector.load %arg5[%c0_5, %c0_6, %c0_7] : memref<1x16x32xf32, #tpu.memory_space<vmem>>, vector<1x16x32xf32>
    %7 = vector.shape_cast %6 : vector<1x16x32xf32> to vector<16x32xf32>
    %8 = vector.extract_strided_slice %3 {offsets = [0, 0], sizes = [16, 8], strides = [1, 1]} : vector<16x32xf32> to vector<16x8xf32>
    %9 = vector.extract_strided_slice %5 {offsets = [0, 0], sizes = [16, 8], strides = [1, 1]} : vector<16x32xf32> to vector<16x8xf32>
    %10 = vector.extract_strided_slice %7 {offsets = [0, 0], sizes = [16, 8], strides = [1, 1]} : vector<16x32xf32> to vector<16x8xf32>
    %cst_8 = arith.constant dense<0.000000e+00> : vector<16x16xf32>
    %11 = tpu.matmul %8, %9, %cst_8 {dimension_numbers = #tpu.dot_dimension_numbers<[1], [1], [0], [0], [0, 0, 1, 0], [], []>} : vector<16x8xf32>, vector<16x8xf32>, vector<16x16xf32> -> vector<16x16xf32>
    %cst_9 = arith.constant dense<0xFF800000> : vector<16xf32>
    %12 = vector.multi_reduction <maximumf>, %11, %cst_9 [1] : vector<16x16xf32> to vector<16xf32>
    %13 = vector.shape_cast %12 : vector<16xf32> to vector<16x1xf32>
    %14 = vector.broadcast %13 : vector<16x1xf32> to vector<16x16xf32>
    %15 = arith.subf %11, %14 : vector<16x16xf32>
    %16 = math.exp %15 : vector<16x16xf32>
    %cst_10 = arith.constant dense<0.000000e+00> : vector<16xf32>
    %17 = vector.multi_reduction <add>, %16, %cst_10 [1] : vector<16x16xf32> to vector<16xf32>
    %18 = vector.shape_cast %17 : vector<16xf32> to vector<16x1xf32>
    %cst_11 = arith.constant 1.000000e+00 : f32
    %19 = vector.broadcast %cst_11 : f32 to vector<16x1xf32>
    %20 = arith.divf %19, %18 : vector<16x1xf32>
    %21 = vector.broadcast %20 : vector<16x1xf32> to vector<16x16xf32>
    %22 = arith.mulf %16, %21 : vector<16x16xf32>
    %c0_12 = arith.constant 0 : index
    %c0_13 = arith.constant 0 : index
    %c0_14 = arith.constant 0 : index
    %c0_15 = arith.constant 0 : index
    %23 = vector.load %arg7[%c0_12, %c0_13, %c0_14, %c0_15] : memref<1x4x16x16xf32, #tpu.memory_space<vmem>>, vector<1x1x16x16xf32>
    %24 = vector.shape_cast %23 : vector<1x1x16x16xf32> to vector<16x16xf32>
    %25 = vector.shape_cast %22 : vector<16x16xf32> to vector<1x1x16x16xf32>
    tpu.vector_store %arg7[%c0_12, %c0_13, %c0_14, %c0_15], %25 {strides = array<i32>} : memref<1x4x16x16xf32, #tpu.memory_space<vmem>>, vector<1x1x16x16xf32>,
    %cst_16 = arith.constant dense<0.000000e+00> : vector<16x8xf32>
    %26 = tpu.matmul %22, %10, %cst_16 {dimension_numbers = #tpu.dot_dimension_numbers<[1], [0], [0], [1], [0, 0, 1, 1], [], []>} : vector<16x16xf32>, vector<16x8xf32>, vector<16x8xf32> -> vector<16x8xf32>
    %27 = vector.extract_strided_slice %3 {offsets = [0, 8], sizes = [16, 8], strides = [1, 1]} : vector<16x32xf32> to vector<16x8xf32>
    %28 = vector.extract_strided_slice %5 {offsets = [0, 8], sizes = [16, 8], strides = [1, 1]} : vector<16x32xf32> to vector<16x8xf32>
    %29 = vector.extract_strided_slice %7 {offsets = [0, 8], sizes = [16, 8], strides = [1, 1]} : vector<16x32xf32> to vector<16x8xf32>
    %cst_17 = arith.constant dense<0.000000e+00> : vector<16x16xf32>
    %30 = tpu.matmul %27, %28, %cst_17 {dimension_numbers = #tpu.dot_dimension_numbers<[1], [1], [0], [0], [0, 0, 1, 0], [], []>} : vector<16x8xf32>, vector<16x8xf32>, vector<16x16xf32> -> vector<16x16xf32>
    %cst_18 = arith.constant dense<0xFF800000> : vector<16xf32>
    %31 = vector.multi_reduction <maximumf>, %30, %cst_18 [1] : vector<16x16xf32> to vector<16xf32>
    %32 = vector.shape_cast %31 : vector<16xf32> to vector<16x1xf32>
    %33 = vector.broadcast %32 : vector<16x1xf32> to vector<16x16xf32>
    %34 = arith.subf %30, %33 : vector<16x16xf32>
    %35 = math.exp %34 : vector<16x16xf32>
    %cst_19 = arith.constant dense<0.000000e+00> : vector<16xf32>
    %36 = vector.multi_reduction <add>, %35, %cst_19 [1] : vector<16x16xf32> to vector<16xf32>
    %37 = vector.shape_cast %36 : vector<16xf32> to vector<16x1xf32>
    %cst_20 = arith.constant 1.000000e+00 : f32
    %38 = vector.broadcast %cst_20 : f32 to vector<16x1xf32>
    %39 = arith.divf %38, %37 : vector<16x1xf32>
    %40 = vector.broadcast %39 : vector<16x1xf32> to vector<16x16xf32>
    %41 = arith.mulf %35, %40 : vector<16x16xf32>
    %c0_21 = arith.constant 0 : index
    %c1 = arith.constant 1 : index
    %c0_22 = arith.constant 0 : index
    %c0_23 = arith.constant 0 : index
    %42 = vector.load %arg7[%c0_21, %c1, %c0_22, %c0_23] : memref<1x4x16x16xf32, #tpu.memory_space<vmem>>, vector<1x1x16x16xf32>
    %43 = vector.shape_cast %42 : vector<1x1x16x16xf32> to vector<16x16xf32>
    %44 = vector.shape_cast %41 : vector<16x16xf32> to vector<1x1x16x16xf32>
    tpu.vector_store %arg7[%c0_21, %c1, %c0_22, %c0_23], %44 {strides = array<i32>} : memref<1x4x16x16xf32, #tpu.memory_space<vmem>>, vector<1x1x16x16xf32>,
    %cst_24 = arith.constant dense<0.000000e+00> : vector<16x8xf32>
    %45 = tpu.matmul %41, %29, %cst_24 {dimension_numbers = #tpu.dot_dimension_numbers<[1], [0], [0], [1], [0, 0, 1, 1], [], []>} : vector<16x16xf32>, vector<16x8xf32>, vector<16x8xf32> -> vector<16x8xf32>
    %46 = vector.extract_strided_slice %3 {offsets = [0, 16], sizes = [16, 8], strides = [1, 1]} : vector<16x32xf32> to vector<16x8xf32>
    %47 = vector.extract_strided_slice %5 {offsets = [0, 16], sizes = [16, 8], strides = [1, 1]} : vector<16x32xf32> to vector<16x8xf32>
    %48 = vector.extract_strided_slice %7 {offsets = [0, 16], sizes = [16, 8], strides = [1, 1]} : vector<16x32xf32> to vector<16x8xf32>
    %cst_25 = arith.constant dense<0.000000e+00> : vector<16x16xf32>
    %49 = tpu.matmul %46, %47, %cst_25 {dimension_numbers = #tpu.dot_dimension_numbers<[1], [1], [0], [0], [0, 0, 1, 0], [], []>} : vector<16x8xf32>, vector<16x8xf32>, vector<16x16xf32> -> vector<16x16xf32>
    %cst_26 = arith.constant dense<0xFF800000> : vector<16xf32>
    %50 = vector.multi_reduction <maximumf>, %49, %cst_26 [1] : vector<16x16xf32> to vector<16xf32>
    %51 = vector.shape_cast %50 : vector<16xf32> to vector<16x1xf32>
    %52 = vector.broadcast %51 : vector<16x1xf32> to vector<16x16xf32>
    %53 = arith.subf %49, %52 : vector<16x16xf32>
    %54 = math.exp %53 : vector<16x16xf32>
    %cst_27 = arith.constant dense<0.000000e+00> : vector<16xf32>
    %55 = vector.multi_reduction <add>, %54, %cst_27 [1] : vector<16x16xf32> to vector<16xf32>
    %56 = vector.shape_cast %55 : vector<16xf32> to vector<16x1xf32>
    %cst_28 = arith.constant 1.000000e+00 : f32
    %57 = vector.broadcast %cst_28 : f32 to vector<16x1xf32>
    %58 = arith.divf %57, %56 : vector<16x1xf32>
    %59 = vector.broadcast %58 : vector<16x1xf32> to vector<16x16xf32>
    %60 = arith.mulf %54, %59 : vector<16x16xf32>
    %c0_29 = arith.constant 0 : index
    %c2 = arith.constant 2 : index
    %c0_30 = arith.constant 0 : index
    %c0_31 = arith.constant 0 : index
    %61 = vector.load %arg7[%c0_29, %c2, %c0_30, %c0_31] : memref<1x4x16x16xf32, #tpu.memory_space<vmem>>, vector<1x1x16x16xf32>
    %62 = vector.shape_cast %61 : vector<1x1x16x16xf32> to vector<16x16xf32>
    %63 = vector.shape_cast %60 : vector<16x16xf32> to vector<1x1x16x16xf32>
    tpu.vector_store %arg7[%c0_29, %c2, %c0_30, %c0_31], %63 {strides = array<i32>} : memref<1x4x16x16xf32, #tpu.memory_space<vmem>>, vector<1x1x16x16xf32>,
    %cst_32 = arith.constant dense<0.000000e+00> : vector<16x8xf32>
    %64 = tpu.matmul %60, %48, %cst_32 {dimension_numbers = #tpu.dot_dimension_numbers<[1], [0], [0], [1], [0, 0, 1, 1], [], []>} : vector<16x16xf32>, vector<16x8xf32>, vector<16x8xf32> -> vector<16x8xf32>
    %65 = vector.extract_strided_slice %3 {offsets = [0, 24], sizes = [16, 8], strides = [1, 1]} : vector<16x32xf32> to vector<16x8xf32>
    %66 = vector.extract_strided_slice %5 {offsets = [0, 24], sizes = [16, 8], strides = [1, 1]} : vector<16x32xf32> to vector<16x8xf32>
    %67 = vector.extract_strided_slice %7 {offsets = [0, 24], sizes = [16, 8], strides = [1, 1]} : vector<16x32xf32> to vector<16x8xf32>
    %cst_33 = arith.constant dense<0.000000e+00> : vector<16x16xf32>
    %68 = tpu.matmul %65, %66, %cst_33 {dimension_numbers = #tpu.dot_dimension_numbers<[1], [1], [0], [0], [0, 0, 1, 0], [], []>} : vector<16x8xf32>, vector<16x8xf32>, vector<16x16xf32> -> vector<16x16xf32>
    %cst_34 = arith.constant dense<0xFF800000> : vector<16xf32>
    %69 = vector.multi_reduction <maximumf>, %68, %cst_34 [1] : vector<16x16xf32> to vector<16xf32>
    %70 = vector.shape_cast %69 : vector<16xf32> to vector<16x1xf32>
    %71 = vector.broadcast %70 : vector<16x1xf32> to vector<16x16xf32>
    %72 = arith.subf %68, %71 : vector<16x16xf32>
    %73 = math.exp %72 : vector<16x16xf32>
    %cst_35 = arith.constant dense<0.000000e+00> : vector<16xf32>
    %74 = vector.multi_reduction <add>, %73, %cst_35 [1] : vector<16x16xf32> to vector<16xf32>
    %75 = vector.shape_cast %74 : vector<16xf32> to vector<16x1xf32>
    %cst_36 = arith.constant 1.000000e+00 : f32
    %76 = vector.broadcast %cst_36 : f32 to vector<16x1xf32>
    %77 = arith.divf %76, %75 : vector<16x1xf32>
    %78 = vector.broadcast %77 : vector<16x1xf32> to vector<16x16xf32>
    %79 = arith.mulf %73, %78 : vector<16x16xf32>
    %c0_37 = arith.constant 0 : index
    %c3 = arith.constant 3 : index
    %c0_38 = arith.constant 0 : index
    %c0_39 = arith.constant 0 : index
    %80 = vector.load %arg7[%c0_37, %c3, %c0_38, %c0_39] : memref<1x4x16x16xf32, #tpu.memory_space<vmem>>, vector<1x1x16x16xf32>
    %81 = vector.shape_cast %80 : vector<1x1x16x16xf32> to vector<16x16xf32>
    %82 = vector.shape_cast %79 : vector<16x16xf32> to vector<1x1x16x16xf32>
    tpu.vector_store %arg7[%c0_37, %c3, %c0_38, %c0_39], %82 {strides = array<i32>} : memref<1x4x16x16xf32, #tpu.memory_space<vmem>>, vector<1x1x16x16xf32>,
    %cst_40 = arith.constant dense<0.000000e+00> : vector<16x8xf32>
    %83 = tpu.matmul %79, %67, %cst_40 {dimension_numbers = #tpu.dot_dimension_numbers<[1], [0], [0], [1], [0, 0, 1, 1], [], []>} : vector<16x16xf32>, vector<16x8xf32>, vector<16x8xf32> -> vector<16x8xf32>
    %84 = tpu.concatenate %26, %45, %64, %83 in 1 : vector<16x8xf32>, vector<16x8xf32>, vector<16x8xf32>, vector<16x8xf32> -> vector<16x32xf32>
    %c0_41 = arith.constant 0 : index
    %c0_42 = arith.constant 0 : index
    %c0_43 = arith.constant 0 : index
    %85 = vector.load %arg6[%c0_41, %c0_42, %c0_43] : memref<1x16x32xf32, #tpu.memory_space<vmem>>, vector<1x16x32xf32>
    %86 = vector.shape_cast %85 : vector<1x16x32xf32> to vector<16x32xf32>
    %87 = vector.shape_cast %84 : vector<16x32xf32> to vector<1x16x32xf32>
    tpu.vector_store %arg6[%c0_41, %c0_42, %c0_43], %87 {strides = array<i32>} : memref<1x16x32xf32, #tpu.memory_space<vmem>>, vector<1x16x32xf32>,
    return
  }
  func.func @transform_0(%arg0: i32, %arg1: i32, %arg2: i32) -> (i32, i32, i32) {
    %c0_i32 = arith.constant 0 : i32
    return %arg0, %arg2, %arg1 : i32, i32, i32
  }
  func.func @transform_1(%arg0: i32, %arg1: i32, %arg2: i32) -> (i32, i32, i32) {
    %c0_i32 = arith.constant 0 : i32
    %c0_i32_0 = arith.constant 0 : i32
    return %arg0, %c0_i32, %arg1 : i32, i32, i32
  }
  func.func @transform_2(%arg0: i32, %arg1: i32, %arg2: i32) -> (i32, i32, i32) {
    %c0_i32 = arith.constant 0 : i32
    %c0_i32_0 = arith.constant 0 : i32
    return %arg0, %c0_i32, %arg1 : i32, i32, i32
  }
  func.func @transform_3(%arg0: i32, %arg1: i32, %arg2: i32) -> (i32, i32, i32) {
    %c0_i32 = arith.constant 0 : i32
    return %arg0, %arg2, %arg1 : i32, i32, i32
  }
  func.func @transform_4(%arg0: i32, %arg1: i32, %arg2: i32) -> (i32, i32, i32, i32) {
    %c0_i32 = arith.constant 0 : i32
    %c0_i32_0 = arith.constant 0 : i32
    return %arg0, %arg1, %arg2, %c0_i32 : i32, i32, i32, i32
  }
}

</mosaic_0001>

<bundles_post_ra>
// kernel: a_call__.3
= control target key start
LH: loop header
LB: loop body
LE: loop exit
PB: predicated region body
PF: predicated region fallthrough
CT: control target
= control target key end

     0   :  { %s198_s0 = inlined_call_operand.vmem [shape: f32[32,32], index: 0, kind: input, shape index: {}]   ;;  %s199_s1 = inlined_call_operand.vmem [shape: f32[32,32], index: 1, kind: input, shape index: {}]   ;;  %s200_s2 = inlined_call_operand.vmem [shape: f32[1,32], index: 2, kind: input, shape index: {}]   ;;  %s201_s3 = inlined_call_operand.hbm [shape: f32[32,32], index: 3, kind: output, shape index: {}]  }
   0x1   :  { %v22_v0 = vld [vmem:[%s199_s1 + $0x18] sm:$0xff]  ;;  %v21_v1 = vld [vmem:[%s199_s1 + $0x10] sm:$0xff]  ;;  %v20_v2 = vld [vmem:[%s199_s1 + $0x8] sm:$0xff] }
   0x2   :  { %96 = vmatpush.msra.mxu2 %v22_v0  ;;  %97 = vmatpush.msra.mxu3 %v22_v0 }
   0x3   :  { %52 = vmatpush.msra.mxu0 %v22_v0  ;;  %95 = vmatpush.msra.mxu1 %v22_v0 }
   0x4   :  { %99 = vmatpush.msra.mxu2 %v21_v1  ;;  %100 = vmatpush.msra.mxu3 %v21_v1 }
   0x5   :  { %8 = vsyncpa [#allocation3], 0  ;;  %v19_v3 = vld [vmem:[%s199_s1] sm:$0xff]  ;;  %53 = vmatpush.msra.mxu0 %v21_v1  ;;  %98 = vmatpush.msra.mxu1 %v21_v1  ;;  %v17_v4 = vld [vmem:[%s198_s0 + $0x10] sm:$0xff]  ;;  %vm27_vm0 = vcmask 261120   ;;  %s137_s29 = smov [#allocation2]  }
   0x6   :  { %102 = vmatpush.msra.mxu2 %v20_v2  ;;  %103 = vmatpush.msra.mxu3 %v20_v2  ;;  %v18_v5 = vld [vmem:[%s198_s0 + $0x18] sm:$0xff]  ;;  %v15_v6 = vld [vmem:[%s198_s0] sm:$0xff]  ;;  %v16_v7 = vld [vmem:[%s198_s0 + $0x8] sm:$0xff]  ;;  %s77_s0 = sshll.u32 %s137_s29, 4  ;;  %s79_s5 = sshll.u32 %s201_s3, 4  ;;  %s78_s0 = int_to_ptr.vmem [resolvable:$true] %s77_s0  ;;  %s80_s5 = int_to_ptr.hbm [resolvable:$true] %s79_s5 }
   0x7   :  { %54 = vmatpush.msra.mxu0 %v20_v2  ;;  %101 = vmatpush.msra.mxu1 %v20_v2  ;;  %v110_v8 = vld [vmem:[%s200_s2] ss:$0 sm:$0xff]  ;;  %s138_s2 = smov 128   ;;  %s139_s6 = smov 8  }
   0x8   :  { %105 = vmatpush.msra.mxu2 %v19_v3  ;;  %106 = vmatpush.msra.mxu3 %v19_v3 }
   0x9   :  { %93 = vmatmul.msk.f32.vlgmr.msra.gmra.mxu2 %vm27_vm0, %v17_v4  ;;  %94 = vmatmul.msk.f32.vlgmr.msra.gmra.mxu3 %vm27_vm0, %v18_v5 }
   0xa   :  { %55 = vmatpush.msra.mxu0 %v19_v3  ;;  %104 = vmatpush.msra.mxu1 %v19_v3 }
   0xb   :  { %91 = vmatmul.msk.f32.vlgmr.msra.gmra.mxu0 %vm27_vm0, %v15_v6  ;;  %92 = vmatmul.msk.f32.vlgmr.msra.gmra.mxu1 %vm27_vm0, %v16_v7 }
  0x88   :  { %v57_v9 = vpop.f32.mrf.mxu0  ;;  %v60_v10 = vpop.f32.mrf.mxu1 }
  0x89   :  { %v58_v11 = vadd.f32 %v110_v8, %v57_v9  ;;  %v61_v12 = vadd.f32 %v110_v8, %v60_v10 }
  0x8b   :  { %69 = vst.msk [vmem:[#allocation2] sm:$0xff] %vm27_vm0, %v58_v11 }
  0x8c   :  { %70 = vst.msk [vmem:[#allocation2 + $0x8] sm:$0xff] %vm27_vm0, %v61_v12  ;;  %v63_v13 = vpop.f32.mrf.mxu2  ;;  %v66_v14 = vpop.f32.mrf.mxu3 }
  0x8d   :  { %v64_v15 = vadd.f32 %v110_v8, %v63_v13  ;;  %v67_v16 = vadd.f32 %v110_v8, %v66_v14 }
  0x8f   :  { %71 = vst.msk [vmem:[#allocation2 + $0x10] sm:$0xff] %vm27_vm0, %v64_v15 }
  0x90   :  { %72 = vst.msk [vmem:[#allocation2 + $0x18] sm:$0xff] %vm27_vm0, %v67_v16 }
  0x91   :  { %85 = dma.vmem_to_hbm [thread:$0]  %s78_s0, 512, %s80_s5, [#allocation3], %s138_s2, %s138_s2, %s139_s6  }
  0x92   :  { %135 = dma.done.wait [#allocation3], 512  }
  0x93   :  { %136 = vsyncadd [#allocation3], 4294966784 }
  0x94   :  { %90 = vsyncpa [#allocation3], 1 }

// kernel: a_call__.2
= control target key start
LH: loop header
LB: loop body
LE: loop exit
PB: predicated region body
PF: predicated region fallthrough
CT: control target
= control target key end

     0   :  { %s1826_s0 = inlined_call_operand.hbm [shape: f32[2,16,32], index: 0, kind: input, shape index: {}]   ;;  %s1827_s1 = inlined_call_operand.hbm [shape: f32[2,16,32], index: 1, kind: input, shape index: {}]   ;;  %s1828_s2 = inlined_call_operand.hbm [shape: f32[2,16,32], index: 2, kind: input, shape index: {}]   ;;  %s1829_s3 = inlined_call_operand.vmem [shape: f32[2,16,32], index: 3, kind: output, shape index: {0}]   ;;  %s1830_s4 = inlined_call_operand.hbm [shape: f32[2,4,16,16], index: 4, kind: output, shape index: {1}]  }
   0x1   :  { %1837 = sst [smem:[#allocation18_spill]] %s1827_s1 }
   0x2   :  { %10 = vsyncpa [#allocation3], 0 }
   0x3   :  { %12 = vsyncpa [#allocation3 + $0x1], 0 }
   0x4   :  { %13 = vsyncpa [#allocation6], 0 }
   0x5   :  { %15 = vsyncpa [#allocation6 + $0x1], 0 }
   0x6   :  { %16 = vsyncpa [#allocation4], 0 }
   0x7   :  { %18 = vsyncpa [#allocation4 + $0x1], 0  ;;  %s1534_s15 = smov 0   ;;  %s1536_s16 = smov 0  }
   0x8   :  { %s1538_s17 = smov 0   ;;  %s1540_s18 = smov 0  }
   0x9   :  { %s1542_s19 = smov 0   ;;  %s1544_s20 = smov 0  }
   0xa LB: > { %1838 = sst [smem:[#allocation12_spill]] %s1486_s17  ;;  %s1565_s21 = sadd.s32 4294967295, %s1498_s20   ;;  %s1498_s20 = sphi %s1544_s20, %s24_s20   ;;  %s1494_s19 = sphi %s1542_s19, %s1856_s19   ;;  %s1490_s18 = sphi %s1540_s18, %s1855_s18   ;;  %s1486_s17 = sphi %s1538_s17, %s1854_s17   ;;  %s1482_s16 = sphi %s1536_s16, %s1858_s16   ;;  %s1478_s15 = sphi %s1534_s15, %s1857_s15  }
   0xb   : > { %1839 = sst [smem:[#allocation13_spill]] %s1494_s19  ;;  %s1135_s22 = sadd.s32 4294967294, %s1498_s20  }
   0xc   : > { %1840 = sst [smem:[#allocation14_spill]] %s1498_s20  ;;  %s43_s23 = sadd.s32 1, %s1494_s19 }
   0xd   : > { %s54_s24 = sadd.s32 1, %s1486_s17  ;;  %p45_p0 = scmp.ge.s32.totalorder %s43_s23, 2 }
   0xe   : > { %p61_p1 = scmp.ne.s32.totalorder %s1486_s17, %s1482_s16  ;;  %p62_p2 = scmp.eq.s32.totalorder %s1498_s20, 0 }
   0xf   : > { %p67_p3 = scmp.ne.s32.totalorder %s1482_s16, %s1478_s15  ;;  %s1860_s23 = smov (%p45_p0, %s43_s23), 0 }
  0x10   : > { %1841 = sst [smem:[#allocation15_spill]] %s1860_s23  ;;  %p1577_p4 = por %p62_p2, %p61_p1 }
  0x11   : > { %p68_p5 = scmp.eq.s32.totalorder %s1565_s21, 0  ;;  %s47_s26 = ssub.s32 %s1494_s19, %s1860_s23 }
  0x12   : > { %p181_p6 = scmp.eq.s32.totalorder %s1565_s21, 1  ;;  %p52_p7 = scmp.eq.s32.totalorder %s47_s26, 0 }
  0x13   : > { %p1585_p8 = por %p68_p5, %p67_p3  ;;  %p187_p10 = scmp.eq.s32.totalorder %s1135_s22, 1 }
  0x14   : > { %p1589_p9 = por %p181_p6, %p61_p1  ;;  %p1137_p12 = scmp.ge.s32.totalorder %s1498_s20, 2 }
  0x15   : > { %s1594_s29 = scalar_select %p52_p7, %s1486_s17, %s54_s24  }
  0x16   : > { %p1596_p11 = por %p187_p10, %p67_p3  ;;  %p1216_p13 = scmp.lt.s32.totalorder %s1498_s20, 2 }
  0x17   : > { %1845 = sst [smem:[#allocation16_spill]] %s1594_s29  ;;  %s207_s5 = sand.u32 1, %s1486_s17  }
  0x18   : > { %s1846_s30 = scalar_select %p1596_p11, 1, 0 }
  0x19   : > { %s1603_s6 = sshll.u32 %s207_s5, 4  ;;  %s1189_s7 = sshll.u32 %s1494_s19, 4 }
  0x1a   : > { %1847 = sst [smem:[#allocation17_spill]] %s1846_s30  ;;  %p1608_p0 = pnand %p1216_p13, %p1577_p4 }
  0x1b   : > { %s232_s9 = sand.u32 1, %s1498_s20   ;;  %s1849_s1 = sld [smem:[#allocation18_spill]] }
  0x1c   : > { %s236_s14 = scalar_lea.vmem [#allocation5], %s1603_s6  ;;  %s233_s24 = scalar_lea.sflag [#allocation6], %s232_s9 }
  0x1d   : > { %s245_s22 = sshll.u32 %s236_s14, 4  ;;  %s1500_s26 = smov 128   ;;  %s246_s22 = int_to_ptr.vmem [resolvable:$true] %s245_s22 }
  0x1e   : > { %s1501_s25 = smov 8   ;;  %p1147_p1 = scmp.ge.s32.totalorder %s1498_s20, 1 }
  0x1f   : > { %p276_p2 = scmp.lt.s32.totalorder %s1498_s20, 3  ;;  %s208_s9 = scalar_lea.sflag [#allocation3], %s207_s5 }
  0x20   : > { %s265_s29 = scalar_lea.hbm %s1828_s2, %s1189_s7  ;;  %s259_s20 = scalar_lea.vmem [#allocation7], %s1603_s6 }
  0x21   : > { %s242_s12 = scalar_lea.hbm %s1849_s1, %s1189_s7  ;;  %p1621_p3 = pnand %p1147_p1, %p276_p2 }
  0x22   : > { %s243_s13 = sshll.u32 %s242_s12, 4  ;;  %s219_s12 = scalar_lea.hbm %s1826_s0, %s1189_s7  ;;  %s244_s13 = int_to_ptr.hbm [resolvable:$true] %s243_s13 }
  0x23   : > { %1208 = dma.hbm_to_vmem [thread:$0]  (!%p1608_p0), %s244_s13, 256, %s246_s22, %s233_s24, %s1500_s26, %s1500_s26, %s1501_s25  }
  0x24   : > { %s220_s14 = sshll.u32 %s219_s12, 4  ;;  %s211_s1 = scalar_lea.vmem [#allocation2], %s1603_s6  ;;  %s221_s14 = int_to_ptr.hbm [resolvable:$true] %s220_s14 }
  0x25   : > { %s222_s19 = sshll.u32 %s211_s1, 4  ;;  %s266_s17 = sshll.u32 %s265_s29, 4  ;;  %s223_s19 = int_to_ptr.vmem [resolvable:$true] %s222_s19  ;;  %s267_s17 = int_to_ptr.hbm [resolvable:$true] %s266_s17 }
  0x26   : > { %1205 = dma.hbm_to_vmem [thread:$0]  (!%p1608_p0), %s221_s14, 256, %s223_s19, %s208_s9, %s1500_s26, %s1500_s26, %s1501_s25  }
  0x27   : > { %s268_s30 = sshll.u32 %s259_s20, 4  ;;  %280 = sbr.rel (%p1621_p3) target bundleno = 1128 (0x468), region = 32  ;;  %s269_s30 = int_to_ptr.vmem [resolvable:$true] %s268_s30 }
  0x28   : > { %1211 = dma.hbm_to_vmem [thread:$0]  (!%p1608_p0), %s267_s17, 256, %s269_s30, %s233_s24, %s1500_s26, %s1500_s26, %s1501_s25  }
  0x29   : > { %s1640_s1 = sand.u32 (!%p1621_p3), 1, %s1482_s16  }
  0x2a   : > { %s1643_s19 = sshll.u32 (!%p1621_p3), %s1640_s1, 4  ;;  %s283_s5 = scalar_lea.sflag (!%p1621_p3), [#allocation3], %s1640_s1 }
  0x2b   : > { %s286_s29 = scalar_lea.vmem (!%p1621_p3), [#allocation2], %s1643_s19 }
  0x2c   : > { %1465 = dma.done.wait (%p1585_p8), %s283_s5, 256  }
  0x2d   : > { %1467 = vsyncadd (%p1585_p8), %s283_s5, 4294967040  ;;  %s292_s17 = sand.u32 1, %s1565_s21   ;;  %s296_s23 = scalar_lea.vmem [#allocation5], %s1643_s19 }
  0x2e   : > { %s293_s20 = scalar_lea.sflag [#allocation6], %s292_s17 }
  0x2f   : > { %1469 = dma.done.wait (%p1585_p8), %s293_s20, 512  }
  0x30   : > { %1471 = vsyncadd (%p1585_p8), %s293_s20, 4294966784  ;;  %vm378_vm0 = vcmask 64512   ;;  %v375_v0 = vld [vmem:[%s296_s23 + $0x8] sm:$0xff]  ;;  %v370_v1 = vld [vmem:[%s286_s29] sm:$0xff]  ;;  %s1502_s21 = smov 120   ;;  %s1503_s27 = smov 112  }
  0x31   : > { %1154 = vmatpush.xpose.msk.msra.mxu0 %vm378_vm0, %v375_v0  ;;  %v374_v2 = vld [vmem:[%s296_s23] sm:$0xff]  ;;  %v372_v3 = vmul.f32 0.35355338, %v370_v1  ;;  %v371_v4 = vld [vmem:[%s286_s29 + $0x8] sm:$0xff]  ;;  %502 = vrot.lane.b32.xlu1 %v375_v0, %s1502_s21  ;;  %vm414_vm1 = vcmask 130048   ;;  %s1504_s30 = smov 104  }
  0x32   : > { %v373_v5 = vmul.f32 0.35355338, %v371_v4  ;;  %500 = vrot.lane.b32.xlu2 %v374_v2, %s1502_s21  ;;  %s306_s6 = scalar_lea.vmem [#allocation7], %s1643_s19  ;;  %s1151_s7 = sshll.u32 %s1640_s1, 6 }
  0x33   : > { %v1676_v21 = vld [vmem:[%s306_s6 + $0x8] sm:$0xff]  ;;  %v1678_v22 = vld [vmem:[%s306_s6] sm:$0xff]  ;;  %s1692_s8 = scalar_lea.vmem [#allocation8], %s1151_s7  ;;  %s1505_s24 = smov 8  }
  0x34   : > { %487 = vmatpush.msra.mxu1 %v1676_v21  ;;  %s1193_s26 = sshll.u32 %s1490_s18, 6  ;;  %s1506_s25 = smov 16  }
  0x35   : > { %1155 = vmatpush.xpose.msk.msra.mxu0 %vm378_vm0, %v374_v2  ;;  %s946_s12 = scalar_lea.hbm %s1830_s4, %s1193_s26  ;;  %s947_s14 = sshll.u32 %s1692_s8, 4  ;;  %s948_s14 = int_to_ptr.vmem [resolvable:$true] %s947_s14 }
  0x36   : > { %488 = vmatpush.msra.mxu1 %v1678_v22  ;;  %s949_s9 = sshll.u32 %s946_s12, 4  ;;  %s926_s13 = scalar_lea.sflag [#allocation4], %s1640_s1  ;;  %s950_s9 = int_to_ptr.hbm [resolvable:$true] %s949_s9 }
  0x37   : > { %s1426_s22 = sshra.s32 %s950_s9, 4  ;;  %s1432_s17 = scalar_lea.hbm %s1830_s4, 128  ;;  %s1427_s22 = int_to_ptr.hbm [resolvable:$true] %s1426_s22 }
  0x38   : > { %1156 = vmatmul.msk.f32.vlgmr.msra.gmra.mxu0 %vm378_vm0, %v372_v3  ;;  %s1428_s19 = scalar_lea.hbm %s1427_s22, 64  ;;  %p1433_p7 = scmp.lt.s32.totalorder %s1427_s22, %s1830_s4 }
  0x39   : > { %631 = vrot.lane.b32.xlu1 %v375_v0, %s1503_s27  ;;  %p1429_p4 = scmp.ne.s32.totalorder %s1427_s22, %s1428_s19  ;;  %p1434_p8 = scmp.lt.s32.totalorder %s1432_s17, %s1428_s19 }
  0x3a   : > { %498 = vrot.lane.b32.xlu2 %v373_v5, %s1502_s21 }
  0x3b   : > { %p1430_p5 = pnand %p1429_p4, %p1589_p9  ;;  %p1435_p10 = por %p1434_p8, %p1433_p7 }
  0x3d   : > { %p1431_p6 = pneg %p1430_p5 }
  0x3f   : > { %p1436_p13 = pnand %p1435_p10, %p1431_p6 }
  0x40   : > { %1157 = vmatmul.msk.f32.gmra.mxu0 %vm378_vm0, %v373_v5 }
  0x42   : > { %629 = vrot.lane.b32.xlu2 %v374_v2, %s1503_s27 }
  0x8c   : > { %v501_v11 = vpop.permute.xlu2 %500 }
  0x94   : > { %v499_v19 = vpop.permute.xlu2 %498 }
  0x9c   : > { %v630_v25 = vpop.permute.xlu2 %629 }
  0xa3   : > { %v503_v10 = vpop.permute.xlu1 %502 }
  0xa4   : > { %1160 = vmatpush.xpose.msk.msra.mxu2 %vm378_vm0, %v503_v10 }
  0xa8   : > { %1161 = vmatpush.xpose.msk.msra.mxu2 %vm378_vm0, %v501_v11 }
  0xab   : > { %v632_v23 = vpop.permute.xlu1 %631 }
  0xac   : > { %1168 = vmatpush.xpose.msk.msrb.mxu1 %vm378_vm0, %v632_v23 }
  0xb0   : > { %1169 = vmatpush.xpose.msk.msrb.mxu1 %vm378_vm0, %v630_v25 }
  0xb5   : > { %v408_v6 = vpop.f32.mrf.mxu0 }
  0xb6   : > { %v415_v7 = vsel %vm414_vm1, %v408_v6, -inf }
  0xb7   : > { %416 = vmax.xlane.f32.xlu0 %v415_v7 }
  0xbd   : > { %v411_v8 = vpop.f32.mrf.mxu0 }
  0xbe   : > { %v418_v9 = vsel %vm414_vm1, %v411_v8, -inf }
  0xbf   : > { %419 = vmax.xlane.f32.xlu0 %v418_v9 }
  0xd3   : > { %496 = vrot.lane.b32.xlu0 %v372_v3, %s1502_s21 }
  0xdb   : > { %758 = vrot.lane.b32.xlu0 %v375_v0, %s1504_s30 }
  0xe3   : > { %625 = vrot.lane.b32.xlu0 %v372_v3, %s1503_s27 }
  0xeb   : > { %754 = vrot.lane.b32.xlu0 %v373_v5, %s1504_s30 }
 0x12a   : > { %v417_v12 = vpop.xlane.xlu0 %416 }
 0x12b   : > { %v421_v13 = vsub.f32 %v408_v6, %v417_v12 }
 0x12d   : > { %v423_v14 = vmul.f32 1.442695, %v421_v13 }
 0x12f   : > { %1290 = vpow2.f32 %v423_v14 }
 0x132   : > { %v420_v15 = vpop.xlane.xlu0 %419 }
 0x133   : > { %v422_v16 = vsub.f32 %v411_v8, %v420_v15 }
 0x135   : > { %v1291_v17 = vpop.eup %1290  ;;  %v425_v18 = vmul.f32 1.442695, %v422_v16 }
 0x136   : > { %v427_v20 = vsel %vm414_vm1, %v1291_v17, 0.0 }
 0x137   : > { %1292 = vpow2.f32 %v425_v18  ;;  %428 = vadd.xlane.f32.xlu1 %v427_v20  ;;  %v1725_v18 = vpack.i.bf16 %v1678_v22, %v1676_v21 }
 0x13d   : > { %v1293_v24 = vpop.eup %1292 }
 0x13e   : > { %v430_v26 = vsel %vm414_vm1, %v1293_v24, 0.0 }
 0x13f   : > { %431 = vadd.xlane.f32.xlu2 %v430_v26 }
 0x145   : > { %v497_v27 = vpop.permute.xlu0 %496 }
 0x146   : > { %1162 = vmatmul.msk.f32.vlgmr.msra.gmra.mxu2 %vm378_vm0, %v497_v27 }
 0x14d   : > { %v759_v28 = vpop.permute.xlu0 %758 }
 0x14e   : > { %1163 = vmatmul.msk.f32.gmra.mxu2 %vm378_vm0, %v499_v19  ;;  %1176 = vmatpush.xpose.msk.msrb.mxu0 %vm378_vm0, %v759_v28 }
 0x150   : > { %756 = vrot.lane.b32.xlu1 %v374_v2, %s1504_s30 }
 0x155   : > { %v626_v50 = vpop.permute.xlu0 %625 }
 0x157   : > { %752 = vrot.lane.b32.xlu2 %v372_v3, %s1504_s30 }
 0x158   : > { %627 = vrot.lane.b32.xlu1 %v373_v5, %s1503_s27 }
 0x15d   : > { %v755_v58 = vpop.permute.xlu0 %754 }
 0x1aa   : > { %v429_v29 = vpop.xlane.xlu1 %428 }
 0x1ab   : > { %1294 = vrcp.f32 %v429_v29  ;;  %v444_v34 = vand.u32 2147483648, %v429_v29  ;;  %v442_v36 = vand.u32 2147483647, %v429_v29  ;;  %vm438_vm3 = vweird.f32 %v429_v29 }
 0x1ad   : > { %v445_v39 = vor.u32 1.1754944e-38, %v444_v34  ;;  %vm443_vm5 = vcmp.eq.f32.partialorder %v442_v36, 8.507059e+37 }
 0x1b1   : > { %v1295_v30 = vpop.eup %1294 }
 0x1b2   : > { %v434_v31 = vmul.f32 %v1295_v30, %v429_v29  ;;  %v432_v32 = vpop.xlane.xlu2 %431  ;;  %vm439_vm2 = vweird.f32 %v1295_v30 }
 0x1b3   : > { %1296 = vrcp.f32 %v432_v32  ;;  %vm440_vm4 = vmor %vm438_vm3, %vm439_vm2  ;;  %v459_v45 = vand.u32 2147483648, %v432_v32  ;;  %v457_v47 = vand.u32 2147483647, %v432_v32  ;;  %vm453_vm7 = vweird.f32 %v432_v32 }
 0x1b4   : > { %v435_v33 = vsub.f32 1.0, %v434_v31 }
 0x1b5   : > { %v460_v49 = vor.u32 1.1754944e-38, %v459_v45  ;;  %vm458_vm9 = vcmp.eq.f32.partialorder %v457_v47, 8.507059e+37 }
 0x1b6   : > { %v436_v35 = vmul.f32 %v1295_v30, %v435_v33 }
 0x1b8   : > { %v437_v37 = vadd.f32 %v1295_v30, %v436_v35 }
 0x1b9   : > { %v1297_v38 = vpop.eup %1296 }
 0x1ba   : > { %v449_v40 = vmul.f32 %v1297_v38, %v432_v32  ;;  %v441_v41 = vsel %vm440_vm4, %v1295_v30, %v437_v37  ;;  %vm454_vm6 = vweird.f32 %v1297_v38  ;;  %v753_v53 = vpop.permute.xlu2 %752 }
 0x1bb   : > { %v446_v42 = vsel %vm443_vm5, %v445_v39, %v441_v41  ;;  %vm455_vm8 = vmor %vm453_vm7, %vm454_vm6 }
 0x1bc   : > { %v450_v43 = vsub.f32 1.0, %v449_v40  ;;  %v463_v44 = vmul.f32 %v1291_v17, %v446_v42 }
 0x1be   : > { %v451_v46 = vmul.f32 %v1297_v38, %v450_v43  ;;  %465 = vst.msk [vmem:[%s1692_s8] sm:$0xff] %vm414_vm1, %v463_v44  ;;  %1158 = vmatmul.msk.f32.vlgmr.msra.gmra.mxu1 %vm414_vm1, %v463_v44 }
 0x1c0   : > { %v452_v48 = vadd.f32 %v1297_v38, %v451_v46 }
 0x1c2   : > { %v757_v51 = vpop.permute.xlu1 %756  ;;  %v456_v52 = vsel %vm455_vm8, %v1297_v38, %v452_v48 }
 0x1c3   : > { %1177 = vmatpush.xpose.msk.msrb.mxu0 %vm378_vm0, %v757_v51  ;;  %v461_v54 = vsel %vm458_vm9, %v460_v49, %v456_v52 }
 0x1c4   : > { %v464_v55 = vmul.f32 %v1293_v24, %v461_v54 }
 0x1c6   : > { %466 = vst.msk [vmem:[%s1692_s8 + $0x8] sm:$0xff] %vm414_vm1, %v464_v55  ;;  %1159 = vmatmul.msk.f32.gmra.mxu1 %vm414_vm1, %v464_v55  ;;  %1178 = vmatmul.msk.f32.vlgmr.msrb.gmra.mxu0 %vm378_vm0, %v753_v53 }
 0x1c9   : > { %v529_v56 = vpop.f32.mrf.mxu2 }
 0x1ca   : > { %v535_v57 = vsel %vm414_vm1, %v529_v56, -inf  ;;  %v628_v61 = vpop.permute.xlu1 %627 }
 0x1cb   : > { %536 = vmax.xlane.f32.xlu2 %v535_v57 }
 0x1ce   : > { %1170 = vmatmul.msk.f32.vlgmr.msrb.gmra.mxu1 %vm378_vm0, %v626_v50  ;;  %1179 = vmatmul.msk.f32.gmra.mxu0 %vm378_vm0, %v755_v58 }
 0x1d1   : > { %v532_v59 = vpop.f32.mrf.mxu2 }
 0x1d2   : > { %v538_v60 = vsel %vm414_vm1, %v532_v59, -inf }
 0x1d3   : > { %539 = vmax.xlane.f32.xlu1 %v538_v60 }
 0x1d6   : > { %1171 = vmatmul.msk.f32.gmra.mxu1 %vm378_vm0, %v628_v61 }
 0x23b   : > { %v1707_v62 = vpop.f32.mrf.mxu1 }
 0x23e   : > { %v537_v63 = vpop.xlane.xlu2 %536 }
 0x23f   : > { %v541_v0 = vsub.f32 %v529_v56, %v537_v63 }
 0x241   : > { %v543_v1 = vmul.f32 1.442695, %v541_v0 }
 0x243   : > { %1298 = vpow2.f32 %v543_v1  ;;  %v1709_v2 = vpop.f32.mrf.mxu1  ;;  %v785_v3 = vpop.f32.mrf.mxu0 }
 0x244   : > { %v791_v4 = vsel %vm414_vm1, %v785_v3, -inf }
 0x245   : > { %792 = vmax.xlane.f32.xlu2 %v791_v4 }
 0x246   : > { %v540_v5 = vpop.xlane.xlu1 %539 }
 0x247   : > { %v542_v7 = vsub.f32 %v532_v59, %v540_v5 }
 0x249   : > { %v1712_v6 = vpop.eup %1298  ;;  %v545_v11 = vmul.f32 1.442695, %v542_v7 }
 0x24a   : > { %v547_v9 = vsel %vm414_vm1, %v1712_v6, 0.0 }
 0x24b   : > { %v658_v8 = vpop.f32.mrf.mxu1  ;;  %v788_v12 = vpop.f32.mrf.mxu0  ;;  %1300 = vpow2.f32 %v545_v11 }
 0x24c   : > { %v664_v10 = vsel %vm414_vm1, %v658_v8, -inf  ;;  %v794_v13 = vsel %vm414_vm1, %v788_v12, -inf }
 0x24d   : > { %548 = vadd.xlane.f32.xlu2 %v547_v9  ;;  %665 = vmax.xlane.f32.xlu0 %v664_v10 }
 0x251   : > { %v1719_v16 = vpop.eup %1300 }
 0x252   : > { %v550_v17 = vsel %vm414_vm1, %v1719_v16, 0.0 }
 0x253   : > { %v661_v14 = vpop.f32.mrf.mxu1 }
 0x254   : > { %v667_v15 = vsel %vm414_vm1, %v661_v14, -inf }
 0x255   : > { %668 = vmax.xlane.f32.xlu1 %v667_v15  ;;  %795 = vmax.xlane.f32.xlu0 %v794_v13 }
 0x25d   : > { %551 = vadd.xlane.f32.xlu1 %v550_v17 }
 0x265   : > { %1276 = vrot.lane.b32.xlu2 %v1725_v18, %s1502_s21 }
 0x2b8   : > { %v793_v19 = vpop.xlane.xlu2 %792 }
 0x2b9   : > { %v797_v20 = vsub.f32 %v785_v3, %v793_v19 }
 0x2bb   : > { %v799_v23 = vmul.f32 1.442695, %v797_v20 }
 0x2bd   : > { %1302 = vpow2.f32 %v799_v23 }
 0x2c0   : > { %v549_v24 = vpop.xlane.xlu2 %548  ;;  %v666_v25 = vpop.xlane.xlu0 %665 }
 0x2c1   : > { %1304 = vrcp.f32 %v549_v24  ;;  %v670_v26 = vsub.f32 %v658_v8, %v666_v25  ;;  %v564_v39 = vand.u32 2147483648, %v549_v24  ;;  %v562_v44 = vand.u32 2147483647, %v549_v24 }
 0x2c2   : > { %vm558_vm11 = vweird.f32 %v549_v24 }
 0x2c3   : > { %v1729_v27 = vpop.eup %1302  ;;  %v672_v28 = vmul.f32 1.442695, %v670_v26  ;;  %v565_v46 = vor.u32 1.1754944e-38, %v564_v39  ;;  %vm563_vm13 = vcmp.eq.f32.partialorder %v562_v44, 8.507059e+37 }
 0x2c4   : > { %v803_v29 = vsel %vm414_vm1, %v1729_v27, 0.0 }
 0x2c5   : > { %1306 = vpow2.f32 %v672_v28  ;;  %804 = vadd.xlane.f32.xlu1 %v803_v29 }
 0x2c7   : > { %v1305_v21 = vpop.eup %1304 }
 0x2c8   : > { %v554_v22 = vmul.f32 %v1305_v21, %v549_v24  ;;  %v669_v30 = vpop.xlane.xlu1 %668  ;;  %v796_v31 = vpop.xlane.xlu0 %795  ;;  %vm559_vm10 = vweird.f32 %v1305_v21 }
 0x2c9   : > { %v671_v32 = vsub.f32 %v661_v14, %v669_v30  ;;  %v798_v33 = vsub.f32 %v788_v12, %v796_v31  ;;  %v1277_v34 = vpop.permute.xlu2 %1276  ;;  %vm560_vm12 = vmor %vm558_vm11, %vm559_vm10 }
 0x2ca   : > { %v555_v35 = vsub.f32 1.0, %v554_v22  ;;  %v1278_v36 = vunpack.i.l.bf16 %v1277_v34  ;;  %v1279_v37 = vunpack.i.h.bf16 %v1277_v34 }
 0x2cb   : > { %v1733_v38 = vpop.eup %1306  ;;  %v674_v40 = vmul.f32 1.442695, %v671_v32  ;;  %v801_v41 = vmul.f32 1.442695, %v798_v33 }
 0x2cc   : > { %v556_v42 = vmul.f32 %v1305_v21, %v555_v35  ;;  %v676_v43 = vsel %vm414_vm1, %v1733_v38, 0.0  ;;  %616 = vmatpush.msra.mxu3 %v1278_v36 }
 0x2cd   : > { %1308 = vpow2.f32 %v674_v40  ;;  %677 = vadd.xlane.f32.xlu0 %v676_v43 }
 0x2ce   : > { %1310 = vpow2.f32 %v801_v41  ;;  %617 = vmatpush.msra.mxu3 %v1279_v37  ;;  %v557_v45 = vadd.f32 %v1305_v21, %v556_v42 }
 0x2d0   : > { %v552_v47 = vpop.xlane.xlu1 %551  ;;  %v561_v48 = vsel %vm560_vm12, %v1305_v21, %v557_v45 }
 0x2d1   : > { %1312 = vrcp.f32 %v552_v47  ;;  %v566_v49 = vsel %vm563_vm13, %v565_v46, %v561_v48  ;;  %v579_v58 = vand.u32 2147483648, %v552_v47  ;;  %v577_v60 = vand.u32 2147483647, %v552_v47 }
 0x2d2   : > { %v583_v50 = vmul.f32 %v1712_v6, %v566_v49  ;;  %vm573_vm15 = vweird.f32 %v552_v47 }
 0x2d3   : > { %v1738_v51 = vpop.eup %1308  ;;  %v580_v63 = vor.u32 1.1754944e-38, %v579_v58  ;;  %vm578_vm3 = vcmp.eq.f32.partialorder %v577_v60, 8.507059e+37 }
 0x2d4   : > { %v1740_v52 = vpop.eup %1310  ;;  %1164 = vst.msk [vmem:[%s1692_s8 + $0x10] sm:$0xff] %vm414_vm1, %v583_v50  ;;  %1166 = vmatmul.msk.f32.vlgmr.msra.gmra.mxu3 %vm414_vm1, %v583_v50  ;;  %v679_v53 = vsel %vm414_vm1, %v1738_v51, 0.0 }
 0x2d5   : > { %680 = vadd.xlane.f32.xlu0 %v679_v53  ;;  %v806_v54 = vsel %vm414_vm1, %v1740_v52, 0.0 }
 0x2d6   : > { %807 = vadd.xlane.f32.xlu1 %v806_v54 }
 0x2d7   : > { %v1313_v55 = vpop.eup %1312 }
 0x2d8   : > { %v569_v56 = vmul.f32 %v1313_v55, %v552_v47  ;;  %vm574_vm14 = vweird.f32 %v1313_v55 }
 0x2d9   : > { %vm575_vm2 = vmor %vm573_vm15, %vm574_vm14 }
 0x2da   : > { %v570_v57 = vsub.f32 1.0, %v569_v56 }
 0x2dc   : > { %v571_v59 = vmul.f32 %v1313_v55, %v570_v57 }
 0x2de   : > { %v572_v61 = vadd.f32 %v1313_v55, %v571_v59 }
 0x2e0   : > { %v576_v0 = vsel %vm575_vm2, %v1313_v55, %v572_v61 }
 0x2e1   : > { %v581_v1 = vsel %vm578_vm3, %v580_v63, %v576_v0 }
 0x2e2   : > { %v584_v3 = vmul.f32 %v1719_v16, %v581_v1 }
 0x2e4   : > { %1165 = vst.msk [vmem:[%s1692_s8 + $0x18] sm:$0xff] %vm414_vm1, %v584_v3  ;;  %1167 = vmatmul.msk.f32.gmra.mxu3 %vm414_vm1, %v584_v3 }
 0x2e9   : > { %1281 = vrot.lane.b32.xlu0 %v1725_v18, %s1503_s27 }
 0x2ef   : > { %1286 = vrot.lane.b32.xlu1 %v1725_v18, %s1504_s30 }
 0x338   : > { %v805_v4 = vpop.xlane.xlu1 %804 }
 0x339   : > { %1314 = vrcp.f32 %v805_v4  ;;  %v820_v9 = vand.u32 2147483648, %v805_v4  ;;  %v818_v11 = vand.u32 2147483647, %v805_v4  ;;  %vm814_vm5 = vweird.f32 %v805_v4 }
 0x33b   : > { %v821_v14 = vor.u32 1.1754944e-38, %v820_v9  ;;  %vm819_vm7 = vcmp.eq.f32.partialorder %v818_v11, 8.507059e+37 }
 0x33f   : > { %v1315_v5 = vpop.eup %1314 }
 0x340   : > { %v810_v6 = vmul.f32 %v1315_v5, %v805_v4  ;;  %v678_v7 = vpop.xlane.xlu0 %677  ;;  %vm815_vm4 = vweird.f32 %v1315_v5 }
 0x341   : > { %1316 = vrcp.f32 %v678_v7  ;;  %vm816_vm6 = vmor %vm814_vm5, %vm815_vm4  ;;  %v693_v23 = vand.u32 2147483648, %v678_v7  ;;  %v691_v26 = vand.u32 2147483647, %v678_v7  ;;  %vm687_vm9 = vweird.f32 %v678_v7 }
 0x342   : > { %v811_v8 = vsub.f32 1.0, %v810_v6 }
 0x343   : > { %v694_v21 = vor.u32 1.1754944e-38, %v693_v23  ;;  %vm692_vm11 = vcmp.eq.f32.partialorder %v691_v26, 8.507059e+37 }
 0x344   : > { %v812_v10 = vmul.f32 %v1315_v5, %v811_v8 }
 0x346   : > { %v813_v12 = vadd.f32 %v1315_v5, %v812_v10 }
 0x347   : > { %v1317_v13 = vpop.eup %1316 }
 0x348   : > { %v683_v15 = vmul.f32 %v1317_v13, %v678_v7  ;;  %v681_v16 = vpop.xlane.xlu0 %680  ;;  %v817_v17 = vsel %vm816_vm6, %v1315_v5, %v813_v12  ;;  %vm688_vm8 = vweird.f32 %v1317_v13 }
 0x349   : > { %v808_v18 = vpop.xlane.xlu1 %807  ;;  %1318 = vrcp.f32 %v681_v16  ;;  %v822_v19 = vsel %vm819_vm7, %v821_v14, %v817_v17  ;;  %vm689_vm10 = vmor %vm687_vm9, %vm688_vm8  ;;  %v708_v36 = vand.u32 2147483648, %v681_v16  ;;  %v706_v40 = vand.u32 2147483647, %v681_v16 }
 0x34a   : > { %v684_v20 = vsub.f32 1.0, %v683_v15  ;;  %1320 = vrcp.f32 %v808_v18  ;;  %v839_v24 = vmul.f32 %v1729_v27, %v822_v19  ;;  %v835_v37 = vand.u32 2147483648, %v808_v18 }
 0x34b   : > { %v833_v42 = vand.u32 2147483647, %v808_v18  ;;  %vm702_vm14 = vweird.f32 %v681_v16  ;;  %vm829_vm15 = vweird.f32 %v808_v18  ;;  %v709_v44 = vor.u32 1.1754944e-38, %v708_v36 }
 0x34c   : > { %v685_v25 = vmul.f32 %v1317_v13, %v684_v20  ;;  %1180 = vst.msk [vmem:[%s1692_s8 + $0x30] sm:$0xff] %vm414_vm1, %v839_v24  ;;  %vm707_vm3 = vcmp.eq.f32.partialorder %v706_v40, 8.507059e+37 }
 0x34d   : > { %vm834_vm5 = vcmp.eq.f32.partialorder %v833_v42, 8.507059e+37 }
 0x34e   : > { %v686_v28 = vadd.f32 %v1317_v13, %v685_v25 }
 0x34f   : > { %v1319_v29 = vpop.eup %1318 }
 0x350   : > { %v1321_v22 = vpop.eup %1320  ;;  %v698_v30 = vmul.f32 %v1319_v29, %v681_v16  ;;  %v690_v31 = vsel %vm689_vm10, %v1317_v13, %v686_v28  ;;  %vm703_vm12 = vweird.f32 %v1319_v29 }
 0x351   : > { %v825_v32 = vmul.f32 %v1321_v22, %v808_v18  ;;  %v695_v33 = vsel %vm692_vm11, %v694_v21, %v690_v31  ;;  %vm830_vm13 = vweird.f32 %v1321_v22  ;;  %vm704_vm2 = vmor %vm702_vm14, %vm703_vm12 }
 0x352   : > { %v699_v34 = vsub.f32 1.0, %v698_v30  ;;  %v712_v27 = vmul.f32 %v1733_v38, %v695_v33  ;;  %v836_v38 = vor.u32 1.1754944e-38, %v835_v37  ;;  %vm831_vm4 = vmor %vm829_vm15, %vm830_vm13 }
 0x353   : > { %v826_v35 = vsub.f32 1.0, %v825_v32 }
 0x354   : > { %v700_v39 = vmul.f32 %v1319_v29, %v699_v34  ;;  %1172 = vst.msk [vmem:[%s1692_s8 + $0x20] sm:$0xff] %vm414_vm1, %v712_v27 }
 0x355   : > { %v827_v41 = vmul.f32 %v1321_v22, %v826_v35 }
 0x356   : > { %v701_v43 = vadd.f32 %v1319_v29, %v700_v39 }
 0x357   : > { %v619_v45 = vpop.f32.mrf.mxu3  ;;  %v828_v46 = vadd.f32 %v1321_v22, %v827_v41 }
 0x358   : > { %881 = vrot.lane.b32.xlu2 %v619_v45, %s1505_s24  ;;  %v705_v47 = vsel %vm704_vm2, %v1319_v29, %v701_v43 }
 0x359   : > { %v710_v48 = vsel %vm707_vm3, %v709_v44, %v705_v47  ;;  %v832_v49 = vsel %vm831_vm4, %v1321_v22, %v828_v46 }
 0x35a   : > { %v713_v50 = vmul.f32 %v1738_v51, %v710_v48  ;;  %v837_v53 = vsel %vm834_vm5, %v836_v38, %v832_v49 }
 0x35b   : > { %v1282_v54 = vpop.permute.xlu0 %1281  ;;  %v840_v55 = vmul.f32 %v1740_v52, %v837_v53 }
 0x35c   : > { %v1283_v56 = vunpack.i.l.bf16 %v1282_v54  ;;  %v1284_v57 = vunpack.i.h.bf16 %v1282_v54  ;;  %1173 = vst.msk [vmem:[%s1692_s8 + $0x28] sm:$0xff] %vm414_vm1, %v713_v50 }
 0x35d   : > { %1181 = vst.msk [vmem:[%s1692_s8 + $0x38] sm:$0xff] %vm414_vm1, %v840_v55 }
 0x35e   : > { %743 = vmatpush.msrb.mxu3 %v1283_v56 }
 0x360   : > { %744 = vmatpush.msrb.mxu3 %v1284_v57 }
 0x361   : > { %v1287_v58 = vpop.permute.xlu1 %1286  ;;  %1174 = vmatmul.msk.f32.vlgmr.msrb.gmra.mxu3 %vm414_vm1, %v712_v27 }
 0x362   : > { %v1288_v59 = vunpack.i.l.bf16 %v1287_v58  ;;  %v1289_v51 = vunpack.i.h.bf16 %v1287_v58 }
 0x364   : > { %870 = vmatpush.msrb.mxu2 %v1288_v59 }
 0x366   : > { %871 = vmatpush.msrb.mxu2 %v1289_v51 }
 0x367   : > { %1182 = vmatmul.msk.f32.vlgmr.msrb.gmra.mxu2 %vm414_vm1, %v839_v24  ;;  %v622_v52 = vpop.f32.mrf.mxu3 }
 0x368   : > { %883 = vrot.lane.b32.xlu2 %v622_v52, %s1505_s24 }
 0x369   : > { %1175 = vmatmul.msk.f32.gmra.mxu3 %vm414_vm1, %v713_v50 }
 0x36f   : > { %1183 = vmatmul.msk.f32.gmra.mxu2 %vm414_vm1, %v840_v55 }
 0x3e4   : > { %v746_v60 = vpop.f32.mrf.mxu3 }
 0x3e5   : > { %889 = vrot.lane.b32.xlu0 %v746_v60, %s1506_s25 }
 0x3e6   : > { %1439 = shalt.err (!%p1436_p13)
}
 0x3e7   : > { %s1507_s1 = smov 128   ;;  %s1508_s21 = smov 24   ;;  %v882_v1 = vpop.permute.xlu2 %881  ;;  %vm907_vm6 = vcmask 195584   ;;  %vm910_vm7 = vcmask 261120  }
 0x3e8   : > { %1200 = dma.vmem_to_hbm [thread:$0]  (%p1589_p9), %s948_s14, 1024, %s950_s9, %s926_s13, %s1507_s1, %s1507_s1, %s1505_s24   ;;  %v903_v5 = vsel %vm378_vm0, %v1707_v62, %v882_v1 }
 0x3e9   : > { %p356_p0 = scmp.lt.s32.totalorder %s1490_s18, 1 }
 0x3ea   : > { %v873_v61 = vpop.f32.mrf.mxu2 }
 0x3eb   : > { %s1862_s18 = smov (!%p356_p0, %s1490_s18), 1 }
 0x3ec   : > { %v749_v63 = vpop.f32.mrf.mxu3  ;;  %s1192_s27 = sshll.u32 %s1862_s18, 4 }
 0x3ed   : > { %897 = vrot.lane.b32.xlu0 %v873_v61, %s1508_s21  ;;  %891 = vrot.lane.b32.xlu2 %v749_v63, %s1506_s25  ;;  %s366_s6 = scalar_lea.vmem %s1829_s3, %s1192_s27 }
 0x3ef   : > { %v884_v4 = vpop.permute.xlu2 %883 }
 0x3f0   : > { %v904_v10 = vsel %vm378_vm0, %v1709_v2, %v884_v4 }
 0x3f2   : > { %v876_v0 = vpop.f32.mrf.mxu2 }
 0x3f3   : > { %899 = vrot.lane.b32.xlu1 %v876_v0, %s1508_s21 }
 0x447   : > { %v892_v9 = vpop.permute.xlu2 %891 }
 0x448   : > { %v906_v11 = vsel %vm414_vm1, %v904_v10, %v892_v9 }
 0x457   : > { %v890_v3 = vpop.permute.xlu0 %889 }
 0x458   : > { %v905_v6 = vsel %vm414_vm1, %v903_v5, %v890_v3 }
 0x45f   : > { %v898_v7 = vpop.permute.xlu0 %897 }
 0x460   : > { %v908_v8 = vsel %vm907_vm6, %v905_v6, %v898_v7 }
 0x461   : > { %911 = vst.msk [vmem:[%s366_s6] sm:$0xff] %vm910_vm7, %v908_v8 }
 0x465   : > { %v900_v12 = vpop.permute.xlu1 %899 }
 0x466   : > { %v909_v13 = vsel %vm907_vm6, %v906_v11, %v900_v12 }
 0x467   : > { %912 = vst.msk [vmem:[%s366_s6 + $0x8] sm:$0xff] %vm910_vm7, %v909_v13 }
 0x468 PF: > { %s1852_s7 = sld [smem:[#allocation14_spill]]  ;;  %s979_s8 = sand.u32 1, %s1478_s15  }
 0x469   : > { %p1213_p9 = pnand %p1137_p12, %p1596_p11  ;;  %s980_s24 = scalar_lea.sflag [#allocation4], %s979_s8 }
 0x46b   : > { %p1214_p1 = pneg %p1213_p9 }
 0x46d   : > { %1473 = dma.done.wait (%p1214_p1), %s980_s24, 1024  }
 0x46e   : > { %1475 = vsyncadd (%p1214_p1), %s980_s24, 4294966272  ;;  %s24_s20 = sadd.s32 1, %s1852_s7   ;;  %s1853_s26 = sld [smem:[#allocation12_spill]] }
 0x46f   : > { %p21_p2 = scmp.ge.s32.totalorder %s24_s20, 4   ;;  %s1854_s17 = sld [smem:[#allocation16_spill]] }
 0x470   : > { %s1855_s18 = sld [smem:[#allocation13_spill]]  ;;  %s1857_s15 = smov %s1482_s16 }
 0x471   : > { %s1856_s19 = sld [smem:[#allocation15_spill]]  ;;  %23 = sbr.rel (!%p21_p2) target bundleno = 10 (0xa), region = 116 }
 0x474   : > { %s1858_s16 = smov %s1853_s26 }
 0x476   :  { %986 = vsyncpa [#allocation3], 1 }
 0x477   :  { %988 = vsyncpa [#allocation3 + $0x1], 1 }
 0x478   :  { %989 = vsyncpa [#allocation6], 1 }
 0x479   :  { %991 = vsyncpa [#allocation6 + $0x1], 1 }
 0x47a   :  { %992 = vsyncpa [#allocation4], 1 }
 0x47b   :  { %994 = vsyncpa [#allocation4 + $0x1], 1 }

</bundles_post_ra>
